<compile_context>
chip_gen: v7x
topology: tpu7x:2x2x1
jax: 0.10.0
libtpu: 0.0.40
codegen_flags: <defaults>
</compile_context>

<pallas_src>
import math

import jax
import jax.numpy as jnp
from jax.experimental import pallas as pl
from jax.experimental.pallas import tpu as pltpu


def _vq_kernel(x_ref, w_in_t_ref, b_in_ref, embed_ref, e_sq_half_ref,
               proj_embed_t_ref, b_out_ref, q_ref, idx_ref):
    x_t = x_ref[0]                           # (dim, tile_t)  activations (conv layout)
    w_in_t = w_in_t_ref[...]                 # (cbd, dim)     W_in^T  (pre-transposed)
    b_in = b_in_ref[...]                     # (cbd, 1)
    embed = embed_ref[...]                   # (K,   cbd)     codebook
    e_sq_half = e_sq_half_ref[...]           # (K,   1)       0.5 * ||e_k||^2 (hoisted)
    proj_embed_t = proj_embed_t_ref[...]     # (dim, K)       (E @ W_out)^T   (hoisted fusion)
    b_out = b_out_ref[...]                   # (dim, 1)

    # project_in (nn.Linear), transposed orientation: h^T = W_in^T x + b_in
    h_t = jnp.dot(w_in_t, x_t, preferred_element_type=jnp.float32) + b_in      # (cbd, tile_t)

    # Nearest code: argmin_k ||h - e_k||^2 == argmin_k (0.5*||e_k||^2 - e_k.h)
    # (||h||^2 is constant per column; the *2 is an exact power-of-two scale -> same argmin.)
    cross_t = jnp.dot(embed, h_t, preferred_element_type=jnp.float32)          # (K, tile_t)
    d2 = e_sq_half - cross_t                                                    # (K, tile_t)

    k_size, tile_t = d2.shape
    iota_k = jax.lax.broadcasted_iota(jnp.int32, (k_size, tile_t), 0)
    dmin = jnp.min(d2, axis=0, keepdims=True)                                   # (1, tile_t)
    # first-index tie-break, matching torch .max(-1).indices on the negated distance
    idx = jnp.min(jnp.where(d2 == dmin, iota_k, k_size), axis=0, keepdims=True)  # (1, tile_t) int32

    # fused dequantize + project_out: out^T = (E W_out)^T @ onehot(idx) + b_out
    onehot = (iota_k == idx).astype(jnp.float32)                                 # (K, tile_t)
    out_t = jnp.dot(proj_embed_t, onehot, preferred_element_type=jnp.float32) + b_out  # (dim, tile_t)

    q_ref[...] = out_t[None, :, :].astype(q_ref.dtype)
    idx_ref[...] = idx[None, :, :].astype(jnp.int32)


def _pick_tile_t(T):
    """Largest lane-dense tile (multiple of 128, capped at 512) dividing T; else full T."""
    for cand in (512, 384, 256, 128):
        if T % cand == 0:
            return cand
    return T


def vector_quantization_forward(x, params, *, tile_t=None):
    """x: (B, dim, T) float32.  Returns (quantized (B, dim, T), embed_ind (B, T), loss (1,))."""
    w_in, b_in, embed, w_out, b_out = params
    B, dim, T = x.shape
    K, cbd = embed.shape
    assert w_in.shape == (dim, cbd) and w_out.shape == (cbd, dim)

    if tile_t is None:
        tile_t = _pick_tile_t(T)
    assert T % tile_t == 0
    assert tile_t == T or tile_t % 128 == 0, "tile_t must be lane-aligned or cover all of T"

    # Constant operands prepared once in the wrapper (tiny weight transforms; no per-step
    # cost, no full-HBM activation transposes).
    embed_f32 = embed.astype(jnp.float32)
    w_in_t = jnp.transpose(w_in).astype(jnp.float32)                                # (cbd, dim)
    proj_embed_t = jnp.transpose(embed_f32 @ w_out.astype(jnp.float32))             # (dim, K)
    e_sq_half = 0.5 * jnp.sum(jnp.square(embed_f32), axis=1, keepdims=True)         # (K, 1)
    b_in_c = b_in.reshape(cbd, 1).astype(jnp.float32)
    b_out_c = b_out.reshape(dim, 1).astype(jnp.float32)

    grid = (B, T // tile_t)
    const = lambda b, t: (0, 0)

    q_out, idx_out = pl.pallas_call(
        _vq_kernel,
        out_shape=(
            jax.ShapeDtypeStruct((B, dim, T), x.dtype),
            jax.ShapeDtypeStruct((B, 1, T), jnp.int32),
        ),
        grid_spec=pltpu.PrefetchScalarGridSpec(
            num_scalar_prefetch=0,
            grid=grid,
            in_specs=[
                pl.BlockSpec((1, dim, tile_t), lambda b, t: (b, 0, t)),  # x slab (conv layout)
                pl.BlockSpec((cbd, dim), const),                         # W_in^T
                pl.BlockSpec((cbd, 1), const),                           # b_in
                pl.BlockSpec((K, cbd), const),                           # codebook
                pl.BlockSpec((K, 1), const),                             # 0.5*||e||^2
                pl.BlockSpec((dim, K), const),                           # (E W_out)^T
                pl.BlockSpec((dim, 1), const),                           # b_out
            ],
            out_specs=[
                pl.BlockSpec((1, dim, tile_t), lambda b, t: (b, 0, t)),  # quantized slab
                pl.BlockSpec((1, 1, tile_t), lambda b, t: (b, 0, t)),    # lane-dense indices
            ],
        ),
        compiler_params=pltpu.CompilerParams(
            dimension_semantics=("parallel", "parallel"),
            vmem_limit_bytes=64 * 1024 * 1024,
        ),
    )(x, w_in_t, b_in_c, embed_f32, e_sq_half, proj_embed_t, b_out_c)

    quantized = q_out                       # already (B, dim, T) — no inverse transpose needed
    embed_ind = idx_out.reshape(B, T)
    loss = jnp.zeros((1,), jnp.float32)     # eval-mode: torch.tensor([0.0])
    return quantized, embed_ind, loss


def _reference_forward(x, params):
    """Pure-JAX reference of the eval-mode forward (faithful to the torch math)."""
    w_in, b_in, embed, w_out, b_out = params
    B, dim, T = x.shape
    h = jnp.transpose(x, (0, 2, 1)).reshape(B * T, dim) @ w_in + b_in
    dist = -(jnp.sum(h * h, 1, keepdims=True) - 2.0 * h @ embed.T
             + jnp.sum(embed * embed, 1)[None, :])
    idx = jnp.argmax(dist, axis=-1)
    q = embed[idx] @ w_out + b_out
    quantized = jnp.transpose(q.reshape(B, T, dim), (0, 2, 1))
    return quantized, idx.reshape(B, T).astype(jnp.int32)


def _init_params(key, dim, codebook_dim, codebook_size):
    """Deterministic synthetic parameters (shapes match the torch module)."""
    k1, k2, k3, k4, k5 = jax.random.split(key, 5)
    lim_in = 1.0 / math.sqrt(dim)
    lim_out = 1.0 / math.sqrt(codebook_dim)
    w_in = jax.random.uniform(k1, (dim, codebook_dim), jnp.float32, -lim_in, lim_in)
    b_in = jax.random.uniform(k2, (codebook_dim,), jnp.float32, -lim_in, lim_in)
    # codebook (kmeans_init would fill it on first forward; use a synthetic init)
    embed = jax.random.uniform(k3, (codebook_size, codebook_dim), jnp.float32, -1.0, 1.0)
    w_out = jax.random.uniform(k4, (codebook_dim, dim), jnp.float32, -lim_out, lim_out)
    b_out = jax.random.uniform(k5, (dim,), jnp.float32, -lim_out, lim_out)
    return w_in, b_in, embed, w_out, b_out


if __name__ == "__main__":
    B, dim, T = 2, 16, 16
    codebook_dim = 8
    codebook_size = 64

    key = jax.random.PRNGKey(0)
    kx, kp = jax.random.split(key)
    x = jax.random.normal(kx, (B, dim, T), jnp.float32)
    params = _init_params(kp, dim, codebook_dim, codebook_size)

    quantized, embed_ind, loss = vector_quantization_forward(x, params)
    quantized = jax.block_until_ready(quantized)
    embed_ind = jax.block_until_ready(embed_ind)
    loss = jax.block_until_ready(loss)

    # validate against pure-JAX reference
    q_ref, idx_ref = _reference_forward(x, params)
    assert quantized.shape == (B, dim, T) and embed_ind.shape == (B, T)
    assert jnp.array_equal(embed_ind, idx_ref)
    assert jnp.allclose(quantized, q_ref, atol=1e-4, rtol=1e-4)
    assert loss.shape == (1,) and float(loss[0]) == 0.0

    print("KERNEL_OK")
</pallas_src>

<mosaic_0001>
module attributes {stable_mosaic.version = 11 : i64} {
  func.func @_vq_kernel(%arg0: i32, %arg1: i32, %arg2: memref<1x16x16xf32, #tpu.memory_space<vmem>>, %arg3: memref<8x16xf32, #tpu.memory_space<vmem>>, %arg4: memref<8x1xf32, #tpu.memory_space<vmem>>, %arg5: memref<64x8xf32, #tpu.memory_space<vmem>>, %arg6: memref<64x1xf32, #tpu.memory_space<vmem>>, %arg7: memref<16x64xf32, #tpu.memory_space<vmem>>, %arg8: memref<16x1xf32, #tpu.memory_space<vmem>>, %arg9: memref<1x16x16xf32, #tpu.memory_space<vmem>>, %arg10: memref<1x1x16xi32, #tpu.memory_space<vmem>>) attributes {dimension_semantics = [#tpu.dimension_semantics<parallel>, #tpu.dimension_semantics<parallel>], iteration_bounds = array<i64: 2, 1>, scalar_prefetch = 0 : i64, scratch_operands = 0 : i64, tpu.core_type = #tpu.core_type<tc>, window_params = [{transform_indices = @transform_0, window_bounds = array<i64: 1, 16, 16>}, {pipeline_mode = #tpu.pipeline_mode<synchronous>, transform_indices = @transform_1, window_bounds = array<i64: 8, 16>}, {pipeline_mode = #tpu.pipeline_mode<synchronous>, transform_indices = @transform_2, window_bounds = array<i64: 8, 1>}, {pipeline_mode = #tpu.pipeline_mode<synchronous>, transform_indices = @transform_3, window_bounds = array<i64: 64, 8>}, {pipeline_mode = #tpu.pipeline_mode<synchronous>, transform_indices = @transform_4, window_bounds = array<i64: 64, 1>}, {pipeline_mode = #tpu.pipeline_mode<synchronous>, transform_indices = @transform_5, window_bounds = array<i64: 16, 64>}, {pipeline_mode = #tpu.pipeline_mode<synchronous>, transform_indices = @transform_6, window_bounds = array<i64: 16, 1>}, {transform_indices = @transform_7, window_bounds = array<i64: 1, 16, 16>}, {transform_indices = @transform_8, window_bounds = array<i64: 1, 1, 16>}]} {
    %c0 = arith.constant 0 : index
    %c0_0 = arith.constant 0 : index
    %c0_1 = arith.constant 0 : index
    %0 = vector.load %arg2[%c0, %c0_0, %c0_1] : memref<1x16x16xf32, #tpu.memory_space<vmem>>, vector<1x16x16xf32>
    %1 = vector.shape_cast %0 : vector<1x16x16xf32> to vector<16x16xf32>
    %c0_2 = arith.constant 0 : index
    %c0_3 = arith.constant 0 : index
    %2 = vector.load %arg3[%c0_2, %c0_3] : memref<8x16xf32, #tpu.memory_space<vmem>>, vector<8x16xf32>
    %c0_4 = arith.constant 0 : index
    %c0_5 = arith.constant 0 : index
    %3 = vector.load %arg4[%c0_4, %c0_5] : memref<8x1xf32, #tpu.memory_space<vmem>>, vector<8x1xf32>
    %c0_6 = arith.constant 0 : index
    %c0_7 = arith.constant 0 : index
    %4 = vector.load %arg5[%c0_6, %c0_7] : memref<64x8xf32, #tpu.memory_space<vmem>>, vector<64x8xf32>
    %c0_8 = arith.constant 0 : index
    %c0_9 = arith.constant 0 : index
    %5 = vector.load %arg6[%c0_8, %c0_9] : memref<64x1xf32, #tpu.memory_space<vmem>>, vector<64x1xf32>
    %c0_10 = arith.constant 0 : index
    %c0_11 = arith.constant 0 : index
    %6 = vector.load %arg7[%c0_10, %c0_11] : memref<16x64xf32, #tpu.memory_space<vmem>>, vector<16x64xf32>
    %c0_12 = arith.constant 0 : index
    %c0_13 = arith.constant 0 : index
    %7 = vector.load %arg8[%c0_12, %c0_13] : memref<16x1xf32, #tpu.memory_space<vmem>>, vector<16x1xf32>
    %cst = arith.constant dense<0.000000e+00> : vector<8x16xf32>
    %8 = tpu.matmul %2, %1, %cst {dimension_numbers = #tpu.dot_dimension_numbers<[1], [0], [0], [1], [0, 0, 1, 1], [], []>} : vector<8x16xf32>, vector<16x16xf32>, vector<8x16xf32> -> vector<8x16xf32>
    %9 = vector.broadcast %3 : vector<8x1xf32> to vector<8x16xf32>
    %10 = arith.addf %8, %9 : vector<8x16xf32>
    %cst_14 = arith.constant dense<0.000000e+00> : vector<64x16xf32>
    %11 = tpu.matmul %4, %10, %cst_14 {dimension_numbers = #tpu.dot_dimension_numbers<[1], [0], [0], [1], [0, 0, 1, 1], [], []>} : vector<64x8xf32>, vector<8x16xf32>, vector<64x16xf32> -> vector<64x16xf32>
    %12 = vector.broadcast %5 : vector<64x1xf32> to vector<64x16xf32>
    %13 = arith.subf %12, %11 : vector<64x16xf32>
    %14 = tpu.iota {dimensions = array<i32: 0>} : vector<64x16xi32>
    %cst_15 = arith.constant dense<0x7F800000> : vector<16xf32>
    %15 = vector.multi_reduction <minimumf>, %13, %cst_15 [0] : vector<64x16xf32> to vector<16xf32>
    %16 = vector.shape_cast %15 : vector<16xf32> to vector<1x16xf32>
    %17 = vector.broadcast %16 : vector<1x16xf32> to vector<64x16xf32>
    %18 = arith.cmpf oeq, %13, %17 : vector<64x16xf32>
    %c64_i32 = arith.constant 64 : i32
    %19 = vector.broadcast %c64_i32 : i32 to vector<64x16xi32>
    %20 = arith.select %18, %14, %19 : vector<64x16xi1>, vector<64x16xi32>
    %cst_16 = arith.constant dense<2147483647> : vector<16xi32>
    %21 = vector.multi_reduction <minsi>, %20, %cst_16 [0] : vector<64x16xi32> to vector<16xi32>
    %22 = vector.shape_cast %21 : vector<16xi32> to vector<1x16xi32>
    %23 = vector.broadcast %22 : vector<1x16xi32> to vector<64x16xi32>
    %24 = arith.cmpi eq, %14, %23 : vector<64x16xi32>
    %25 = arith.extui %24 : vector<64x16xi1> to vector<64x16xi32>
    %26 = arith.sitofp %25 : vector<64x16xi32> to vector<64x16xf32>
    %cst_17 = arith.constant dense<0.000000e+00> : vector<16x16xf32>
    %27 = tpu.matmul %6, %26, %cst_17 {dimension_numbers = #tpu.dot_dimension_numbers<[1], [0], [0], [1], [0, 0, 1, 1], [], []>} : vector<16x64xf32>, vector<64x16xf32>, vector<16x16xf32> -> vector<16x16xf32>
    %28 = vector.broadcast %7 : vector<16x1xf32> to vector<16x16xf32>
    %29 = arith.addf %27, %28 : vector<16x16xf32>
    %30 = vector.shape_cast %29 : vector<16x16xf32> to vector<1x16x16xf32>
    %c0_18 = arith.constant 0 : index
    %c0_19 = arith.constant 0 : index
    %c0_20 = arith.constant 0 : index
    %31 = vector.load %arg9[%c0_18, %c0_19, %c0_20] : memref<1x16x16xf32, #tpu.memory_space<vmem>>, vector<1x16x16xf32>
    tpu.vector_store %arg9[%c0_18, %c0_19, %c0_20], %30 {strides = array<i32>} : memref<1x16x16xf32, #tpu.memory_space<vmem>>, vector<1x16x16xf32>,
    %32 = vector.shape_cast %22 : vector<1x16xi32> to vector<1x1x16xi32>
    %c0_21 = arith.constant 0 : index
    %c0_22 = arith.constant 0 : index
    %c0_23 = arith.constant 0 : index
    %33 = vector.load %arg10[%c0_21, %c0_22, %c0_23] : memref<1x1x16xi32, #tpu.memory_space<vmem>>, vector<1x1x16xi32>
    tpu.vector_store %arg10[%c0_21, %c0_22, %c0_23], %32 {strides = array<i32>} : memref<1x1x16xi32, #tpu.memory_space<vmem>>, vector<1x1x16xi32>,
    return
  }
  func.func @transform_0(%arg0: i32, %arg1: i32) -> (i32, i32, i32) {
    %c0_i32 = arith.constant 0 : i32
    %c0_i32_0 = arith.constant 0 : i32
    return %arg0, %c0_i32, %arg1 : i32, i32, i32
  }
  func.func @transform_1(%arg0: i32, %arg1: i32) -> (i32, i32) {
    %c0_i32 = arith.constant 0 : i32
    %c0_i32_0 = arith.constant 0 : i32
    %c0_i32_1 = arith.constant 0 : i32
    return %c0_i32, %c0_i32_0 : i32, i32
  }
  func.func @transform_2(%arg0: i32, %arg1: i32) -> (i32, i32) {
    %c0_i32 = arith.constant 0 : i32
    %c0_i32_0 = arith.constant 0 : i32
    %c0_i32_1 = arith.constant 0 : i32
    return %c0_i32, %c0_i32_0 : i32, i32
  }
  func.func @transform_3(%arg0: i32, %arg1: i32) -> (i32, i32) {
    %c0_i32 = arith.constant 0 : i32
    %c0_i32_0 = arith.constant 0 : i32
    %c0_i32_1 = arith.constant 0 : i32
    return %c0_i32, %c0_i32_0 : i32, i32
  }
  func.func @transform_4(%arg0: i32, %arg1: i32) -> (i32, i32) {
    %c0_i32 = arith.constant 0 : i32
    %c0_i32_0 = arith.constant 0 : i32
    %c0_i32_1 = arith.constant 0 : i32
    return %c0_i32, %c0_i32_0 : i32, i32
  }
  func.func @transform_5(%arg0: i32, %arg1: i32) -> (i32, i32) {
    %c0_i32 = arith.constant 0 : i32
    %c0_i32_0 = arith.constant 0 : i32
    %c0_i32_1 = arith.constant 0 : i32
    return %c0_i32, %c0_i32_0 : i32, i32
  }
  func.func @transform_6(%arg0: i32, %arg1: i32) -> (i32, i32) {
    %c0_i32 = arith.constant 0 : i32
    %c0_i32_0 = arith.constant 0 : i32
    %c0_i32_1 = arith.constant 0 : i32
    return %c0_i32, %c0_i32_0 : i32, i32
  }
  func.func @transform_7(%arg0: i32, %arg1: i32) -> (i32, i32, i32) {
    %c0_i32 = arith.constant 0 : i32
    %c0_i32_0 = arith.constant 0 : i32
    return %arg0, %c0_i32, %arg1 : i32, i32, i32
  }
  func.func @transform_8(%arg0: i32, %arg1: i32) -> (i32, i32, i32) {
    %c0_i32 = arith.constant 0 : i32
    %c0_i32_0 = arith.constant 0 : i32
    return %arg0, %c0_i32, %arg1 : i32, i32, i32
  }
}

</mosaic_0001>

<bundles_post_ra>
// kernel: tpu_custom_call.1
= control target key start
LH: loop header
LB: loop body
LE: loop exit
PB: predicated region body
PF: predicated region fallthrough
CT: control target
= control target key end

     0   :  { %s2237_s0 = inlined_call_operand.hbm [shape: f32[2,16,16], index: 0, kind: input, shape index: {}]   ;;  %s2238_s1 = inlined_call_operand.hbm [shape: f32[8,16], index: 1, kind: input, shape index: {}]   ;;  %s2239_s2 = inlined_call_operand.hbm [shape: f32[8,1], index: 2, kind: input, shape index: {}]   ;;  %s2240_s3 = inlined_call_operand.hbm [shape: f32[64,8], index: 3, kind: input, shape index: {}]   ;;  %s2241_s4 = inlined_call_operand.hbm [shape: f32[64,1], index: 4, kind: input, shape index: {}]   ;;  %s2242_s5 = inlined_call_operand.hbm [shape: f32[16,64], index: 5, kind: input, shape index: {}]   ;;  %s2243_s6 = inlined_call_operand.hbm [shape: f32[16,1], index: 6, kind: input, shape index: {}]   ;;  %s2244_s7 = inlined_call_operand.hbm [shape: f32[2,16,16], index: 7, kind: output, shape index: {0}]   ;;  %s2245_s8 = inlined_call_operand.hbm [shape: s32[2,1,16], index: 8, kind: output, shape index: {1}]  }
   0x1   :  { %2253 = sst [smem:[#allocation23_spill]] %s2238_s1 }
   0x2   :  { %2254 = sst [smem:[#allocation24_spill]] %s2240_s3 }
   0x3   :  { %2255 = sst [smem:[#allocation25_spill]] %s2244_s7 }
   0x4   :  { %14 = vsyncpa [#allocation3], 0 }
   0x5   :  { %16 = vsyncpa [#allocation3 + $0x1], 0 }
   0x6   :  { %17 = vsyncpa [#allocation6], 0 }
   0x7   :  { %18 = vsyncpa [#allocation9], 0 }
   0x8   :  { %19 = vsyncpa [#allocation12], 0 }
   0x9   :  { %20 = vsyncpa [#allocation4], 0 }
   0xa   :  { %22 = vsyncpa [#allocation4 + $0x1], 0 }
   0xb   :  { %23 = vsyncpa [#allocation16], 0 }
   0xc   :  { %25 = vsyncpa [#allocation16 + $0x1], 0  ;;  %s1784_s27 = smov 0   ;;  %s1786_s28 = smov 0  }
   0xd   :  { %s1788_s29 = smov 0   ;;  %s1790_s30 = smov 0  }
   0xe   :  { %s1792_s9 = smov 0   ;;  %s1794_s10 = smov 0  }
   0xf LB: > { %s2249_s11 = sadd.s32 4294967295, %s1719_s10   ;;  %p1120_p0 = scmp.ge.s32.totalorder %s1719_s10, 1  ;;  %s1719_s10 = sphi %s1794_s10, %s31_s10   ;;  %s1715_s9 = sphi %s1792_s9, %s2280_s9   ;;  %s1711_s30 = sphi %s1790_s30, %s2279_s30   ;;  %s1707_s29 = sphi %s1788_s29, %s2278_s29   ;;  %s1703_s28 = sphi %s1786_s28, %s2277_s28   ;;  %s1699_s27 = sphi %s1784_s27, %s2276_s27  }
  0x10   : > { %p1818_p1 = scmp.eq.s32.totalorder %s2249_s11, 0  ;;  %p258_p2 = scmp.lt.s32.totalorder %s1719_s10, 3 }
  0x11   : > { %s1721_s14 = smov [#allocation5]   ;;  %s1722_s16 = smov [#allocation8]  }
  0x12   : > { %s2256_s12 = scalar_select %p1818_p1, 1, 0 }
  0x13   : > { %p1823_p3 = pnand %p1120_p0, %p258_p2  ;;  %s271_s15 = sshll.u32 %s1721_s14, 4  ;;  %s272_s15 = int_to_ptr.vmem [resolvable:$true] %s271_s15 }
  0x14   : > { %s292_s17 = sshll.u32 %s1722_s16, 4  ;;  %s1723_s19 = smov [#allocation11]   ;;  %s1836_s17 = int_to_ptr.vmem [resolvable:$true] %s292_s17 }
  0x15   : > { %s2257_s13 = scalar_select %p1823_p3, 1, 0 }
  0x16   : > { %p1286_p5 = pneg %p1823_p3  ;;  %s1838_s20 = sshll.u32 %s1723_s19, 4  ;;  %s319_s20 = int_to_ptr.vmem [resolvable:$true] %s1838_s20 }
  0x17   : > { %s2259_s1 = sld [smem:[#allocation23_spill]] }
  0x18   : > { %p1832_p6 = pnand %p1286_p5, %p1818_p1 }
  0x1a   : > { %p1848_p8 = pneg %p1832_p6 }
  0x1d   : > { %s1395_s23 = scalar_lea.hbm %s2259_s1, 128 }
  0x1e   : > { %p1396_p7 = scmp.ne.s32.totalorder %s2259_s1, %s1395_s23  ;;  %p1402_p11 = scmp.lt.u32.totalorder %s1395_s23, %s2259_s1 }
  0x20   : > { %p1398_p9 = pnand %p1848_p8, %p1396_p7 }
  0x22   : > { %p1399_p10 = pneg %p1398_p9 }
  0x24   : > { %p1404_p12 = pnand %p1402_p11, %p1399_p10 }
  0x26   : > { %1407 = shalt.err (!%p1404_p12)
}
  0x27   : > { %s1408_s19 = scalar_lea.vmem %s272_s15, 128  ;;  %p1416_p5 = scmp.lt.s32.totalorder %s272_s15, %s272_s15 }
  0x28   : > { %p1409_p13 = scmp.ne.s32.totalorder %s272_s15, %s1408_s19  ;;  %p1417_p4 = scmp.lt.s32.totalorder %s1408_s19, %s1408_s19 }
  0x2a   : > { %p1411_p0 = pnand %p1409_p13, %p1848_p8  ;;  %p1418_p3 = por %p1417_p4, %p1416_p5 }
  0x2c   : > { %p1412_p2 = pneg %p1411_p0 }
  0x2e   : > { %p1419_p1 = pnand %p1418_p3, %p1412_p2 }
  0x30   : > { %1422 = shalt.err (!%p1419_p1)
}
  0x31   : > { %1289 = dma.hbm_to_vmem [thread:$0]  (!%p1832_p6), %s2259_s1, 128, %s272_s15, [#allocation6]  }
  0x32   : > { %s2261_s3 = sld [smem:[#allocation24_spill]] }
  0x38   : > { %s1423_s25 = scalar_lea.hbm %s2261_s3, 1024 }
  0x39   : > { %p1424_p7 = scmp.ne.s32.totalorder %s2261_s3, %s1423_s25  ;;  %p1430_p1 = scmp.lt.u32.totalorder %s1423_s25, %s2261_s3 }
  0x3b   : > { %p1426_p9 = pnand %p1424_p7, %p1848_p8 }
  0x3d   : > { %p1427_p4 = pneg %p1426_p9 }
  0x3f   : > { %p1432_p3 = pnand %p1430_p1, %p1427_p4 }
  0x41   : > { %1435 = shalt.err (!%p1432_p3)
}
  0x42   : > { %s1436_s15 = scalar_lea.vmem %s1836_s17, 1024  ;;  %p1444_p13 = scmp.lt.s32.totalorder %s1836_s17, %s1836_s17 }
  0x43   : > { %p1437_p10 = scmp.ne.s32.totalorder %s1836_s17, %s1436_s15  ;;  %p1445_p0 = scmp.lt.s32.totalorder %s1436_s15, %s1436_s15 }
  0x45   : > { %p1439_p11 = pnand %p1437_p10, %p1848_p8  ;;  %p1446_p2 = por %p1445_p0, %p1444_p13 }
  0x47   : > { %p1440_p12 = pneg %p1439_p11 }
  0x49   : > { %p1447_p5 = pnand %p1446_p2, %p1440_p12 }
  0x4b   : > { %1450 = shalt.err (!%p1447_p5)
}
  0x4c   : > { %s2251_s21 = smov 128   ;;  %s1725_s11 = smov 8  }
  0x4d   : > { %1295 = dma.hbm_to_vmem [thread:$0]  (!%p1832_p6), %s2261_s3, 1024, %s1836_s17, [#allocation9], %s2251_s21, %s2251_s21, %s1725_s11  }
  0x4e   : > { %s1451_s14 = scalar_lea.hbm %s2242_s5, 256 }
  0x4f   : > { %p1452_p7 = scmp.ne.s32.totalorder %s2242_s5, %s1451_s14  ;;  %p1458_p1 = scmp.lt.u32.totalorder %s1451_s14, %s2242_s5 }
  0x51   : > { %p1454_p9 = pnand %p1452_p7, %p1848_p8 }
  0x53   : > { %p1455_p4 = pneg %p1454_p9 }
  0x55   : > { %p1460_p3 = pnand %p1458_p1, %p1455_p4 }
  0x57   : > { %1463 = shalt.err (!%p1460_p3)
}
  0x58   : > { %s1464_s22 = scalar_lea.vmem %s319_s20, 256  ;;  %p1472_p13 = scmp.lt.s32.totalorder %s319_s20, %s319_s20 }
  0x59   : > { %p1465_p10 = scmp.ne.s32.totalorder %s319_s20, %s1464_s22  ;;  %p1473_p0 = scmp.lt.s32.totalorder %s1464_s22, %s1464_s22 }
  0x5b   : > { %p1467_p11 = pnand %p1465_p10, %p1848_p8  ;;  %p1474_p2 = por %p1473_p0, %p1472_p13 }
  0x5d   : > { %p1468_p12 = pneg %p1467_p11 }
  0x5f   : > { %p1475_p5 = pnand %p1474_p2, %p1468_p12 }
  0x61   : > { %1478 = shalt.err (!%p1475_p5)
}
  0x62   : > { %1301 = dma.hbm_to_vmem [thread:$0]  (!%p1832_p6), %s2242_s5, 256, %s319_s20, [#allocation12], %s2251_s21, %s2251_s21, %s1725_s11  }
  0x63   : > { %s1726_s23 = smov [#allocation7]   ;;  %s1727_s25 = smov [#allocation10]  }
  0x64   : > { %s282_s24 = sshll.u32 %s1726_s23, 4  ;;  %s305_s14 = sshll.u32 %s1727_s25, 4  ;;  %s283_s24 = int_to_ptr.vmem [resolvable:$true] %s282_s24  ;;  %s306_s14 = int_to_ptr.vmem [resolvable:$true] %s305_s14 }
  0x65   : > { %s1479_s15 = scalar_lea.hbm %s2239_s2, 128 }
  0x66   : > { %p1480_p7 = scmp.ne.s32.totalorder %s2239_s2, %s1479_s15  ;;  %p1486_p1 = scmp.lt.u32.totalorder %s1479_s15, %s2239_s2 }
  0x68   : > { %p1482_p9 = pnand %p1480_p7, %p1848_p8 }
  0x6a   : > { %p1483_p4 = pneg %p1482_p9 }
  0x6c   : > { %p1488_p3 = pnand %p1486_p1, %p1483_p4 }
  0x6e   : > { %1491 = shalt.err (!%p1488_p3)
}
  0x6f   : > { %s1492_s20 = scalar_lea.vmem %s283_s24, 128  ;;  %p1500_p13 = scmp.lt.s32.totalorder %s283_s24, %s283_s24 }
  0x70   : > { %p1493_p10 = scmp.ne.s32.totalorder %s283_s24, %s1492_s20  ;;  %p1501_p0 = scmp.lt.s32.totalorder %s1492_s20, %s1492_s20 }
  0x72   : > { %p1495_p11 = pnand %p1493_p10, %p1848_p8  ;;  %p1502_p2 = por %p1501_p0, %p1500_p13 }
  0x74   : > { %p1496_p12 = pneg %p1495_p11 }
  0x76   : > { %p1503_p5 = pnand %p1502_p2, %p1496_p12 }
  0x78   : > { %1506 = shalt.err (!%p1503_p5)
}
  0x79   : > { %1292 = dma.hbm_to_vmem [thread:$0]  (!%p1832_p6), %s2239_s2, 128, %s283_s24, [#allocation6]  }
  0x7a   : > { %s1507_s25 = scalar_lea.hbm %s2241_s4, 1024 }
  0x7b   : > { %p1508_p7 = scmp.ne.s32.totalorder %s2241_s4, %s1507_s25  ;;  %p1514_p1 = scmp.lt.u32.totalorder %s1507_s25, %s2241_s4 }
  0x7d   : > { %p1510_p9 = pnand %p1508_p7, %p1848_p8 }
  0x7f   : > { %p1511_p4 = pneg %p1510_p9 }
  0x81   : > { %p1516_p3 = pnand %p1514_p1, %p1511_p4 }
  0x83   : > { %1519 = shalt.err (!%p1516_p3)
}
  0x84   : > { %s1520_s1 = scalar_lea.vmem %s306_s14, 1024  ;;  %p1528_p13 = scmp.lt.s32.totalorder %s306_s14, %s306_s14 }
  0x85   : > { %p1521_p10 = scmp.ne.s32.totalorder %s306_s14, %s1520_s1  ;;  %p1529_p0 = scmp.lt.s32.totalorder %s1520_s1, %s1520_s1 }
  0x87   : > { %p1523_p11 = pnand %p1521_p10, %p1848_p8  ;;  %p1530_p2 = por %p1529_p0, %p1528_p13 }
  0x89   : > { %p1524_p12 = pneg %p1523_p11 }
  0x8b   : > { %p1531_p5 = pnand %p1530_p2, %p1524_p12 }
  0x8d   : > { %1534 = shalt.err (!%p1531_p5)
}
  0x8e   : > { %1298 = dma.hbm_to_vmem [thread:$0]  (!%p1832_p6), %s2241_s4, 1024, %s306_s14, [#allocation9], %s2251_s21, %s2251_s21, %s1725_s11  }
  0x8f   : > { %s1728_s3 = smov [#allocation13]   ;;  %s1535_s25 = scalar_lea.hbm %s2243_s6, 256 }
  0x90   : > { %s331_s17 = sshll.u32 %s1728_s3, 4  ;;  %p1536_p7 = scmp.ne.s32.totalorder %s2243_s6, %s1535_s25  ;;  %s332_s17 = int_to_ptr.vmem [resolvable:$true] %s331_s17 }
  0x91   : > { %p1542_p1 = scmp.lt.u32.totalorder %s1535_s25, %s2243_s6 }
  0x92   : > { %p1538_p9 = pnand %p1536_p7, %p1848_p8 }
  0x94   : > { %p1539_p4 = pneg %p1538_p9 }
  0x96   : > { %p1544_p3 = pnand %p1542_p1, %p1539_p4 }
  0x98   : > { %1547 = shalt.err (!%p1544_p3)
}
  0x99   : > { %s1548_s14 = scalar_lea.vmem %s332_s17, 256  ;;  %p1556_p13 = scmp.lt.s32.totalorder %s332_s17, %s332_s17 }
  0x9a   : > { %p1549_p10 = scmp.ne.s32.totalorder %s332_s17, %s1548_s14  ;;  %p1557_p0 = scmp.lt.s32.totalorder %s1548_s14, %s1548_s14 }
  0x9c   : > { %p1551_p11 = pnand %p1549_p10, %p1848_p8  ;;  %p1558_p2 = por %p1557_p0, %p1556_p13 }
  0x9e   : > { %p1552_p12 = pneg %p1551_p11 }
  0xa0   : > { %p1559_p5 = pnand %p1558_p2, %p1552_p12 }
  0xa2   : > { %1562 = shalt.err (!%p1559_p5)
}
  0xa3   : > { %1304 = dma.hbm_to_vmem [thread:$0]  (!%p1832_p6), %s2243_s6, 256, %s332_s17, [#allocation12], %s2251_s21, %s2251_s21, %s1725_s11  }
  0xa4   : > { %s1119_s18 = sadd.s32 4294967294, %s1719_s10   ;;  %s43_s26 = sadd.s32 1, %s1715_s9 }
  0xa5   : > { %p45_p8 = scmp.ge.s32.totalorder %s43_s26, 2  ;;  %s52_s20 = sadd.s32 1, %s1707_s29 }
  0xa6   : > { %p59_p7 = scmp.ne.s32.totalorder %s1707_s29, %s1703_s28  ;;  %p60_p9 = scmp.eq.s32.totalorder %s1719_s10, 0 }
  0xa7   : > { %s2282_s26 = smov (%p45_p8, %s43_s26), 0  ;;  %p65_p1 = scmp.ne.s32.totalorder %s1703_s28, %s1699_s27 }
  0xa8   : > { %p1980_p4 = por %p60_p9, %p59_p7  ;;  %s47_s17 = ssub.s32 %s1715_s9, %s2282_s26 }
  0xa9   : > { %s2263_s7 = sadd.s32 4294967295, %s1719_s10   ;;  %p50_p3 = scmp.eq.s32.totalorder %s47_s17, 0 }
  0xaa   : > { %p217_p6 = scmp.eq.s32.totalorder %s2263_s7, 1  ;;  %p2264_p10 = scmp.ne.s32.totalorder %s2256_s12, 0 }
  0xab   : > { %p223_p13 = scmp.eq.s32.totalorder %s1119_s18, 1  ;;  %p1322_p2 = scmp.lt.s32.totalorder %s1719_s10, 2 }
  0xac   : > { %p1992_p11 = por %p2264_p10, %p65_p1  ;;  %p1996_p12 = por %p217_p6, %p59_p7 }
  0xad   : > { %s2001_s16 = scalar_select %p50_p3, %s1707_s29, %s52_s20  }
  0xae   : > { %s2266_s25 = scalar_select %p1996_p12, 1, 0 }
  0xaf   : > { %p2003_p0 = por %p223_p13, %p65_p1  ;;  %s345_s15 = sand.u32 1, %s1707_s29  }
  0xb0   : > { %s1173_s22 = sshll.u32 %s1715_s9, 8  ;;  %s1128_s14 = sshll.u32 %s345_s15, 4 }
  0xb1   : > { %s2267_s19 = scalar_select %p2003_p0, 1, 0 }
  0xb2   : > { %s2013_s17 = scalar_lea.hbm %s2237_s0, %s1173_s22  ;;  %s349_s18 = scalar_lea.vmem [#allocation2], %s1128_s14 }
  0xb3   : > { %s357_s20 = sshll.u32 %s349_s18, 4  ;;  %p2017_p5 = pnand %p1322_p2, %p1980_p4  ;;  %s2021_s20 = int_to_ptr.vmem [resolvable:$true] %s357_s20 }
  0xb4   : > { %s2023_s21 = scalar_lea.sflag [#allocation3], %s345_s15  ;;  %s1563_s1 = scalar_lea.hbm %s2013_s17, 256 }
  0xb5   : > { %p1564_p8 = scmp.ne.s32.totalorder %s2013_s17, %s1563_s1  ;;  %p1565_p7 = pneg %p2017_p5 }
  0xb6   : > { %s1568_s14 = scalar_lea.hbm %s2237_s0, 512  ;;  %p1569_p4 = scmp.lt.u32.totalorder %s2013_s17, %s2237_s0 }
  0xb7   : > { %p1566_p9 = pnand %p1565_p7, %p1564_p8  ;;  %p1570_p6 = scmp.lt.u32.totalorder %s1568_s14, %s1563_s1 }
  0xb8   : > { %p1572_p10 = scmp.lt.u32.totalorder %s1563_s1, %s2013_s17 }
  0xb9   : > { %p1567_p1 = pneg %p1566_p9  ;;  %p1571_p3 = por %p1570_p6, %p1569_p4 }
  0xbb   : > { %p1573_p13 = por %p1572_p10, %p1571_p3 }
  0xbd   : > { %p1574_p2 = pnand %p1573_p13, %p1567_p1 }
  0xbf   : > { %1577 = shalt.err (!%p1574_p2)
}
  0xc0   : > { %s1578_s15 = scalar_lea.vmem %s2021_s20, 256  ;;  %s1729_s22 = smov [#allocation2]  }
  0xc1   : > { %p1579_p8 = scmp.ne.s32.totalorder %s2021_s20, %s1578_s15  ;;  %s1583_s3 = sshll.u32 %s1729_s22, 4  ;;  %s1584_s3 = int_to_ptr.vmem [resolvable:$false] %s1583_s3 }
  0xc2   : > { %s1585_s24 = scalar_lea.vmem %s1584_s3, 512  ;;  %p1586_p12 = scmp.lt.s32.totalorder %s2021_s20, %s1584_s3 }
  0xc3   : > { %p1581_p9 = pnand %p1579_p8, %p1565_p7  ;;  %p1587_p4 = scmp.lt.s32.totalorder %s1585_s24, %s1578_s15 }
  0xc5   : > { %p1582_p0 = pneg %p1581_p9  ;;  %p1588_p6 = por %p1587_p4, %p1586_p12 }
  0xc7   : > { %p1589_p3 = pnand %p1588_p6, %p1582_p0 }
  0xc9   : > { %1592 = shalt.err (!%p1589_p3)
}
  0xca   : > { %s2269_s1 = smov 128   ;;  %p2270_p7 = scmp.ne.s32.totalorder %s2257_s13, 0 }
  0xcb   : > { %1308 = dma.hbm_to_vmem [thread:$0]  (!%p2017_p5), %s2013_s17, 256, %s2021_s20, %s2023_s21, %s2269_s1, %s2269_s1, %s1725_s11  }
  0xcc   : > { %369 = sbr.rel (%p2270_p7) target bundleno = 962 (0x3c2), region = 48  ;;  %s2057_s14 = sand.u32 (!%p2270_p7), 1, %s1703_s28  }
  0xcd   : > { %s1132_s18 = sshll.u32 (!%p2270_p7), %s2057_s14, 4  ;;  %s372_s15 = scalar_lea.sflag (!%p2270_p7), [#allocation3], %s2057_s14 }
  0xce   : > { %s375_s7 = scalar_lea.vmem (!%p2270_p7), [#allocation2], %s1132_s18 }
  0xd3   : > { %1674 = dma.done.wait (%p1992_p11), %s372_s15, 256  }
  0xd4   : > { %1676 = vsyncadd (%p1992_p11), %s372_s15, 4294967040  ;;  %p2271_p12 = scmp.ne.s32.totalorder %s2256_s12, 0 }
  0xd6   : > { %1678 = dma.done.wait (%p2271_p12), [#allocation6], 256  }
  0xd7   : > { %1680 = vsyncadd (%p2271_p12), [#allocation6], 4294967040 }
  0xd8   : > { %1682 = dma.done.wait (%p2271_p12), [#allocation9], 2048  }
  0xd9   : > { %1684 = vsyncadd (%p2271_p12), [#allocation9], 4294965248 }
  0xda   : > { %1686 = dma.done.wait (%p2271_p12), [#allocation12], 512  }
  0xdb   : > { %1688 = vsyncadd (%p2271_p12), [#allocation12], 4294966784  ;;  %v1730_v0 = vmov 0.0|0.0   ;;  %vm1731_vm0 = vmmov 0   ;;  %v1732_v1 = vmov 0.0   ;;  %v1733_v2 = vmov 0  }
  0xdc   : > { %1237 = vmatprep.subr.bf16.mxu0 %v1730_v0  ;;  %1201 = vmatprep.mubr.msk.f32.mxu0 %vm1731_vm0, %v1732_v1  ;;  %v436_v3 = vld [vmem:[%s375_s7] sm:$0xff]  ;;  %v437_v4 = vld [vmem:[%s375_s7 + $0x8] sm:$0xff]  ;;  %vm465_vm1 = vcmask 130048   ;;  %vm539_vm2 = vcmask 64512   ;;  %vm828_vm3 = vcmask 523264   ;;  %s435_s12 = scalar_lea.vmem [#allocation15], %s2057_s14 }
  0xdd   : > { %1393 = vset.pattern.permute.xlu0 %v1733_v2  ;;  %1394 = vset.pattern.permute.xlu1 %v1733_v2  ;;  %v1238_v5 = vpack.c.bf16 %v437_v4, %v436_v3  ;;  %v439_v6 = vld [vmem:[#allocation7] sm:$0xff]  ;;  %v438_v7 = vld [vmem:[#allocation5] sm:$0xff]  ;;  %v448_v8 = vld [vmem:[#allocation10] sm:$0xff]  ;;  %s1170_s13 = sshll.u32 %s1711_s30, 4  ;;  %s950_s17 = sshll.u32 %s435_s12, 4  ;;  %s951_s17 = int_to_ptr.vmem [resolvable:$true] %s950_s17 }
  0xde   : > { %462 = vperm.xlu0 %1393, %v439_v6   ;;  %v451_v9 = vld [vmem:[#allocation10 + $0x18] sm:$0xff]  ;;  %v453_v10 = vld [vmem:[#allocation10 + $0x28] sm:$0xff]  ;;  %v440_v13 = vld [vmem:[#allocation8] sm:$0xff]  ;;  %s2158_s23 = scalar_lea.hbm %s2245_s8, %s1170_s13  ;;  %s920_s20 = scalar_lea.sflag [#allocation16], %s2057_s14 }
  0xdf   : > { %1239 = vmatpush3.bf16.msra.mxu0 %v1238_v5  ;;  %v455_v11 = vld [vmem:[#allocation10 + $0x38] sm:$0xff]  ;;  %1206 = vmatprep.mubr.msk.f32.mxu1 %vm539_vm2, %v440_v13  ;;  %v449_v14 = vld [vmem:[#allocation10 + $0x8] sm:$0xff]  ;;  %v450_v15 = vld [vmem:[#allocation10 + $0x10] sm:$0xff]  ;;  %s1593_s22 = scalar_lea.vmem %s951_s17, 16  ;;  %p2272_p0 = scmp.ne.s32.totalorder %s2266_s25, 0 }
  0xe0   : > { %v459_v12 = vld [vmem:[#allocation13 + $0x8] sm:$0xff]  ;;  %676 = vperm.xlu1 %1394, %v449_v14   ;;  %v452_v16 = vld [vmem:[#allocation10 + $0x20] sm:$0xff]  ;;  %v454_v17 = vld [vmem:[#allocation10 + $0x30] sm:$0xff]  ;;  %p1594_p11 = scmp.ne.s32.totalorder %s951_s17, %s1593_s22  ;;  %s1735_s3 = smov [#allocation15]  }
  0xe1   : > { %v458_v18 = vld [vmem:[#allocation13] sm:$0xff]  ;;  %v441_v23 = vld [vmem:[#allocation8 + $0x8] sm:$0xff]  ;;  %v443_v25 = vld [vmem:[#allocation8 + $0x18] sm:$0xff]  ;;  %s1597_s24 = sshll.u32 %s1735_s3, 4  ;;  %s1598_s24 = int_to_ptr.vmem [resolvable:$false] %s1597_s24 }
  0xe2   : > { %1202 = vmatmul.mubr.msk.f32.vlgmr.msra.gmra.mrb[0].mxu0 %vm465_vm1, %v438_v7  ;;  %671 = vperm.xlu0 %1393, %v448_v8   ;;  %v442_v24 = vld [vmem:[#allocation8 + $0x10] sm:$0xff]  ;;  %v444_v26 = vld [vmem:[#allocation8 + $0x20] sm:$0xff]  ;;  %v445_v27 = vld [vmem:[#allocation8 + $0x28] sm:$0xff]  ;;  %v717_v7 = vlaneseq  ;;  %p1595_p5 = pnand %p1594_p11, %p2272_p0  ;;  %s1599_s1 = scalar_lea.vmem %s1598_s24, 32 }
  0xe3   : > { %v446_v28 = vld [vmem:[#allocation8 + $0x30] sm:$0xff]  ;;  %v447_v29 = vld [vmem:[#allocation8 + $0x38] sm:$0xff]  ;;  %v456_v30 = vld [vmem:[#allocation11] sm:$0xff]  ;;  %p1600_p10 = scmp.lt.s32.totalorder %s951_s17, %s1598_s24  ;;  %p1601_p13 = scmp.lt.s32.totalorder %s1599_s1, %s1593_s22 }
  0xe4   : > { %681 = vperm.xlu1 %1394, %v450_v15   ;;  %p1596_p1 = pneg %p1595_p5 }
  0xe5   : > { %p1602_p2 = por %p1601_p13, %p1600_p10 }
  0xe6   : > { %686 = vperm.xlu0 %1393, %v451_v9  }
  0xe7   : > { %p1603_p8 = pnand %p1602_p2, %p1596_p1 }
  0xe8   : > { %691 = vperm.xlu1 %1394, %v452_v16  }
  0xea   : > { %696 = vperm.xlu0 %1393, %v453_v10   ;;  %v2106_v10 = vshrl.u32 %v717_v7, 7 }
  0xec   : > { %701 = vperm.xlu1 %1394, %v454_v17   ;;  %v2109_v13 = vadd.s32 16, %v2106_v10  ;;  %v2112_v14 = vadd.s32 24, %v2106_v10  ;;  %v2115_v15 = vadd.s32 48, %v2106_v10  ;;  %v2118_v16 = vadd.s32 56, %v2106_v10 }
  0xee   : > { %706 = vperm.xlu0 %1393, %v455_v11  }
  0xf0   : > { %820 = vperm.xlu1 %1394, %v458_v18   ;;  %v719_v18 = vadd.s32 8, %v2106_v10 }
  0xf2   : > { %825 = vperm.xlu0 %1393, %v459_v12  }
 0x15d   : > { %v463_v19 = vpop.permute.xlu0 %462 }
 0x15f   : > { %v677_v32 = vpop.permute.xlu1 %676 }
 0x161   : > { %v672_v31 = vpop.permute.xlu0 %671 }
 0x163   : > { %v682_v35 = vpop.permute.xlu1 %681 }
 0x165   : > { %v687_v33 = vpop.permute.xlu0 %686 }
 0x167   : > { %v692_v40 = vpop.permute.xlu1 %691 }
 0x169   : > { %v697_v39 = vpop.permute.xlu0 %696 }
 0x16b   : > { %v702_v56 = vpop.permute.xlu1 %701 }
 0x16d   : > { %v707_v50 = vpop.permute.xlu0 %706 }
 0x1b5   : > { %v535_v20 = vpop.f32.mrb[0].mxu0 }
 0x1b6   : > { %v536_v21 = vadd.f32 %v535_v20, %v463_v19  ;;  %v1203_v22 = vpop.f32.mrb[1].mxu0  ;;  %v2122_v19 = vadd.s32 32, %v2106_v10  ;;  %v2125_v20 = vadd.s32 40, %v2106_v10 }
 0x1b8   : > { %1204 = vmatprep.subr.mxu1 %v536_v21 }
 0x1b9   : > { %1205 = vmatpush3.msra.mxu1 %v536_v21 }
 0x1ba   : > { %1207 = vmatmul.mubr.msk.f32.vlgmr.msra.gmra.mrb[0].mxu1 %vm539_vm2, %v441_v23 }
 0x1bb   : > { %1209 = vmatprep.mubr.msk.f32.mxu1 %vm539_vm2, %v442_v24 }
 0x1be   : > { %1210 = vmatmul.mubr.msk.f32.gmra.mrb[2].mxu1 %vm539_vm2, %v443_v25 }
 0x1bf   : > { %1212 = vmatprep.mubr.msk.f32.mxu1 %vm539_vm2, %v444_v26 }
 0x1c2   : > { %1213 = vmatmul.mubr.msk.f32.gmra.mrb[4].mxu1 %vm539_vm2, %v445_v27 }
 0x1c3   : > { %1215 = vmatprep.mubr.msk.f32.mxu1 %vm539_vm2, %v446_v28 }
 0x1c6   : > { %1216 = vmatmul.mubr.msk.f32.gmra.mrb[6].mxu1 %vm539_vm2, %v447_v29 }
 0x1c7   : > { %1234 = vmatprep.mubr.msk.f32.mxu1 %vm828_vm3, %v456_v30 }
 0x28d   : > { %v1208_v34 = vpop.f32.mrb[0].mxu1 }
 0x28e   : > { %v630_v36 = vpop.f32.mrb[1].mxu1  ;;  %v2089_v41 = vsub.f32 %v677_v32, %v1208_v34 }
 0x28f   : > { %v2091_v42 = vsub.f32 %v672_v31, %v630_v36 }
 0x290   : > { %v727_v47 = vsel %vm465_vm1, %v2089_v41, inf }
 0x291   : > { %v1211_v37 = vpop.f32.mrb[2].mxu1  ;;  %v726_v51 = vsel %vm465_vm1, %v2091_v42, inf }
 0x292   : > { %v640_v38 = vpop.f32.mrb[3].mxu1  ;;  %v712_v48 = vsub.f32 %v687_v33, %v1211_v37 }
 0x293   : > { %v711_v52 = vsub.f32 %v682_v35, %v640_v38 }
 0x294   : > { %v729_v61 = vsel %vm465_vm1, %v712_v48, inf }
 0x295   : > { %v1214_v43 = vpop.f32.mrb[4].mxu1  ;;  %v728_v0 = vsel %vm465_vm1, %v711_v52, inf }
 0x296   : > { %v2093_v44 = vsub.f32 %v697_v39, %v1214_v43  ;;  %v650_v45 = vpop.f32.mrb[5].mxu1 }
 0x297   : > { %v713_v46 = vsub.f32 %v692_v40, %v650_v45 }
 0x298   : > { %v732_v49 = vsel %vm465_vm1, %v2093_v44, inf }
 0x299   : > { %v733_v53 = vmin.f32 %v727_v47, %v732_v49  ;;  %v730_v54 = vsel %vm465_vm1, %v713_v46, inf  ;;  %v1217_v55 = vpop.f32.mrb[6].mxu1 }
 0x29a   : > { %v731_v57 = vmin.f32 %v726_v51, %v730_v54  ;;  %v716_v58 = vsub.f32 %v707_v50, %v1217_v55  ;;  %v660_v59 = vpop.f32.mrb[7].mxu1  ;;  %v1734_v50 = vmov 1.0|1.0   ;;  %v457_v51 = vld [vmem:[#allocation11 + $0x8] sm:$0xff] }
 0x29b   : > { %v715_v60 = vsub.f32 %v702_v56, %v660_v59 }
 0x29c   : > { %v738_v62 = vmin.f32 %v731_v57, %v733_v53  ;;  %v736_v63 = vsel %vm465_vm1, %v716_v58, inf }
 0x29d   : > { %v737_v1 = vmin.f32 %v729_v61, %v736_v63  ;;  %v734_v2 = vsel %vm465_vm1, %v715_v60, inf }
 0x29e   : > { %v735_v3 = vmin.f32 %v728_v0, %v734_v2 }
 0x2a0   : > { %v739_v4 = vmin.f32 %v735_v3, %v737_v1 }
 0x2a2   : > { %v740_v5 = vmin.f32 %v738_v62, %v739_v4 }
 0x2a4   : > { %v741_v6 = vrot.slane %v740_v5, 4 }
 0x2a6   : > { %v742_v8 = vmin.f32 %v740_v5, %v741_v6 }
 0x2a8   : > { %v743_v9 = vrot.slane %v742_v8, 2 }
 0x2aa   : > { %v744_v11 = vmin.f32 %v742_v8, %v743_v9 }
 0x2ac   : > { %v745_v12 = vrot.slane %v744_v11, 1 }
 0x2ae   : > { %v746_v17 = vmin.f32 %v744_v11, %v745_v12 }
 0x2b0   : > { %vm749_vm4 = vcmp.eq.f32.partialorder %v711_v52, %v746_v17  ;;  %vm750_vm5 = vcmp.eq.f32.partialorder %v712_v48, %v746_v17  ;;  %vm753_vm6 = vcmp.eq.f32.partialorder %v715_v60, %v746_v17  ;;  %vm754_vm7 = vcmp.eq.f32.partialorder %v716_v58, %v746_v17 }
 0x2b1   : > { %v757_v21 = vsel %vm749_vm4, %v2109_v13, 64  ;;  %v758_v22 = vsel %vm750_vm5, %v2112_v14, 64  ;;  %v761_v23 = vsel %vm753_vm6, %v2115_v15, 64  ;;  %v762_v24 = vsel %vm754_vm7, %v2118_v16, 64 }
 0x2b2   : > { %v765_v25 = vsel %vm465_vm1, %v757_v21, 2147483647  ;;  %v766_v26 = vsel %vm465_vm1, %v758_v22, 2147483647  ;;  %v773_v27 = vsel %vm465_vm1, %v761_v23, 2147483647  ;;  %vm747_vm8 = vcmp.eq.f32.partialorder %v2091_v42, %v746_v17 }
 0x2b3   : > { %vm774_vm9 = vcmp.lt.s32.totalorder %v765_v25, %v773_v27  ;;  %v776_v28 = vsel %vm465_vm1, %v762_v24, 2147483647  ;;  %vm748_vm10 = vcmp.eq.f32.partialorder %v2089_v41, %v746_v17  ;;  %vm751_vm11 = vcmp.eq.f32.partialorder %v713_v46, %v746_v17 }
 0x2b4   : > { %v775_v29 = vsel %vm774_vm9, %v765_v25, %v773_v27  ;;  %vm777_vm12 = vcmp.lt.s32.totalorder %v766_v26, %v776_v28  ;;  %vm752_vm13 = vcmp.eq.f32.partialorder %v2093_v44, %v746_v17  ;;  %v755_v30 = vsel %vm747_vm8, %v2106_v10, 64 }
 0x2b5   : > { %v778_v31 = vsel %vm777_vm12, %v766_v26, %v776_v28  ;;  %v756_v32 = vsel %vm748_vm10, %v719_v18, 64  ;;  %v759_v33 = vsel %vm751_vm11, %v2122_v19, 64  ;;  %v760_v34 = vsel %vm752_vm13, %v2125_v20, 64 }
 0x2b6   : > { %vm781_vm14 = vcmp.lt.s32.totalorder %v775_v29, %v778_v31  ;;  %v763_v35 = vsel %vm465_vm1, %v755_v30, 2147483647  ;;  %v764_v36 = vsel %vm465_vm1, %v756_v32, 2147483647  ;;  %v767_v37 = vsel %vm465_vm1, %v759_v33, 2147483647 }
 0x2b7   : > { %v782_v38 = vsel %vm781_vm14, %v775_v29, %v778_v31  ;;  %vm768_vm15 = vcmp.lt.s32.totalorder %v763_v35, %v767_v37  ;;  %v770_v39 = vsel %vm465_vm1, %v760_v34, 2147483647  ;;  %vm912_vm7 = vcmask 122880  }
 0x2b8   : > { %v769_v40 = vsel %vm768_vm15, %v763_v35, %v767_v37  ;;  %vm771_vm0 = vcmp.lt.s32.totalorder %v764_v36, %v770_v39 }
 0x2b9   : > { %v772_v41 = vsel %vm771_vm0, %v764_v36, %v770_v39 }
 0x2ba   : > { %vm779_vm2 = vcmp.lt.s32.totalorder %v769_v40, %v772_v41 }
 0x2bb   : > { %v780_v42 = vsel %vm779_vm2, %v769_v40, %v772_v41 }
 0x2bc   : > { %vm783_vm4 = vcmp.lt.s32.totalorder %v780_v42, %v782_v38 }
 0x2bd   : > { %v784_v43 = vsel %vm783_vm4, %v780_v42, %v782_v38 }
 0x2be   : > { %v785_v44 = vrot.slane %v784_v43, 4 }
 0x2c0   : > { %vm786_vm5 = vcmp.lt.s32.totalorder %v784_v43, %v785_v44 }
 0x2c1   : > { %v787_v45 = vsel %vm786_vm5, %v784_v43, %v785_v44 }
 0x2c2   : > { %v788_v46 = vrot.slane %v787_v45, 2 }
 0x2c4   : > { %vm789_vm6 = vcmp.lt.s32.totalorder %v787_v45, %v788_v46 }
 0x2c5   : > { %v790_v47 = vsel %vm789_vm6, %v787_v45, %v788_v46 }
 0x2c6   : > { %v791_v48 = vrot.slane %v790_v47, 1 }
 0x2c8   : > { %vm792_vm8 = vcmp.lt.s32.totalorder %v790_v47, %v791_v48 }
 0x2c9   : > { %v793_v49 = vsel %vm792_vm8, %v790_v47, %v791_v48 }
 0x2ca   : > { %vm794_vm9 = vcmp.eq.s32.totalorder %v2106_v10, %v793_v49  ;;  %vm795_vm10 = vcmp.eq.s32.totalorder %v719_v18, %v793_v49  ;;  %vm796_vm11 = vcmp.eq.s32.totalorder %v2109_v13, %v793_v49  ;;  %vm797_vm12 = vcmp.eq.s32.totalorder %v2112_v14, %v793_v49  ;;  %913 = vst.msk [vmem:[%s435_s12] sm:$0x1] %vm912_vm7, %v793_v49 }
 0x2cb   : > { %vm1240_vm13 = vmpackc.low %vm795_vm10, %vm794_vm9  ;;  %vm798_vm15 = vcmp.eq.s32.totalorder %v2122_v19, %v793_v49  ;;  %vm799_vm0 = vcmp.eq.s32.totalorder %v2125_v20, %v793_v49  ;;  %vm800_vm4 = vcmp.eq.s32.totalorder %v2115_v15, %v793_v49  ;;  %vm801_vm5 = vcmp.eq.s32.totalorder %v2118_v16, %v793_v49 }
 0x2cc   : > { %1241 = vmatprep.subr.msk.bf16.mxu1 %vm1240_vm13, %v1734_v50  ;;  %vm1244_vm14 = vmpackc.low %vm797_vm12, %vm796_vm11 }
 0x2cd   : > { %1243 = vmatpush3.bf16.msk.msra.mxu1 %vm1240_vm13, %v1734_v50  ;;  %vm1248_vm2 = vmpackc.low %vm799_vm0, %vm798_vm15 }
 0x2ce   : > { %1245 = vmatprep.subr.msk.bf16.mxu1 %vm1244_vm14, %v1734_v50  ;;  %vm1252_vm6 = vmpackc.low %vm801_vm5, %vm800_vm4 }
 0x2d1   : > { %1247 = vmatpush3.bf16.msk.msra.mxu1 %vm1244_vm14, %v1734_v50 }
 0x2d2   : > { %1249 = vmatprep.subr.msk.bf16.mxu1 %vm1248_vm2, %v1734_v50 }
 0x2d5   : > { %1251 = vmatpush3.bf16.msk.msra.mxu1 %vm1248_vm2, %v1734_v50 }
 0x2d6   : > { %1253 = vmatprep.subr.msk.bf16.mxu1 %vm1252_vm6, %v1734_v50 }
 0x2d9   : > { %1255 = vmatpush3.bf16.msk.msra.mxu1 %vm1252_vm6, %v1734_v50 }
 0x2dc   : > { %1235 = vmatmul.mubr.msk.f32.vlgmr.msra.gmra.mrb[8].mxu1 %vm828_vm3, %v457_v51 }
 0x2dd   : > { %1606 = shalt.err (!%p1603_p8)
}
 0x2de   : > { %s1607_s15 = scalar_lea.hbm %s2158_s23, 16  ;;  %s1611_s13 = scalar_lea.hbm %s2245_s8, 32 }
 0x2df   : > { %p1608_p9 = scmp.ne.s32.totalorder %s2158_s23, %s1607_s15  ;;  %p1612_p3 = scmp.lt.u32.totalorder %s2158_s23, %s2245_s8 }
 0x2e0   : > { %p1613_p7 = scmp.lt.u32.totalorder %s1611_s13, %s1607_s15  ;;  %p1615_p11 = scmp.lt.u32.totalorder %s1607_s15, %s2158_s23 }
 0x2e1   : > { %p1609_p4 = pnand %p1608_p9, %p2272_p0 }
 0x2e2   : > { %p1614_p12 = por %p1613_p7, %p1612_p3 }
 0x2e3   : > { %p1610_p6 = pneg %p1609_p4 }
 0x2e4   : > { %p1616_p5 = por %p1615_p11, %p1614_p12 }
 0x2e6   : > { %p1617_p1 = pnand %p1616_p5, %p1610_p6 }
 0x2e8   : > { %1620 = shalt.err (!%p1617_p1)
}
 0x2e9   : > { %1283 = dma.vmem_to_hbm [thread:$0]  (%p2272_p0), %s951_s17, 16, %s2158_s23, %s920_s20   ;;  %v826_v52 = vpop.permute.xlu0 %825  ;;  %v821_v54 = vpop.permute.xlu1 %820 }
 0x2ea   : > { %s429_s22 = scalar_lea.vmem [#allocation14], %s1132_s18  ;;  %s1174_s24 = sshll.u32 %s1711_s30, 8 }
 0x2eb   : > { %s933_s3 = sshll.u32 %s429_s22, 4  ;;  %s2273_s7 = sld [smem:[#allocation25_spill]]  ;;  %s2181_s3 = int_to_ptr.vmem [resolvable:$true] %s933_s3 }
 0x2ec   : > { %s915_s30 = scalar_lea.sflag [#allocation4], %s2057_s14  ;;  %s1621_s18 = scalar_lea.vmem %s2181_s3, 256 }
 0x2ed   : > { %p1622_p10 = scmp.ne.s32.totalorder %s2181_s3, %s1621_s18  ;;  %s1736_s17 = smov [#allocation14]  }
 0x2ee   : > { %s1625_s20 = sshll.u32 %s1736_s17, 4  ;;  %s1626_s20 = int_to_ptr.vmem [resolvable:$false] %s1625_s20 }
 0x2ef   : > { %p1623_p13 = pnand %p1622_p10, %p2272_p0  ;;  %s1627_s12 = scalar_lea.vmem %s1626_s20, 512 }
 0x2f0   : > { %p1628_p8 = scmp.lt.s32.totalorder %s2181_s3, %s1626_s20  ;;  %p1629_p9 = scmp.lt.s32.totalorder %s1627_s12, %s1621_s18 }
 0x2f1   : > { %s2186_s23 = scalar_lea.hbm %s2273_s7, %s1174_s24  ;;  %p1624_p2 = pneg %p1623_p13 }
 0x2f2   : > { %p1630_p4 = por %p1629_p9, %p1628_p8 }
 0x2f4   : > { %p1631_p6 = pnand %p1630_p4, %p1624_p2 }
 0x3af   : > { %v1236_v53 = vpop.f32.mrb[8].mxu1 }
 0x3b0   : > { %v907_v55 = vadd.f32 %v1236_v53, %v826_v52  ;;  %v901_v56 = vpop.f32.mrb[9].mxu1 }
 0x3b1   : > { %v902_v57 = vadd.f32 %v901_v56, %v821_v54 }
 0x3b2   : > { %911 = vst.msk [vmem:[%s429_s22 + $0x8] sm:$0xff] %vm465_vm1, %v907_v55 }
 0x3b3   : > { %910 = vst.msk [vmem:[%s429_s22] sm:$0xff] %vm465_vm1, %v902_v57 }
 0x3b4   : > { %1634 = shalt.err (!%p1631_p6)
}
 0x3b5   : > { %s1635_s13 = scalar_lea.hbm %s2186_s23, 256  ;;  %s1639_s22 = scalar_lea.hbm %s2273_s7, 512 }
 0x3b6   : > { %p1636_p3 = scmp.ne.s32.totalorder %s2186_s23, %s1635_s13  ;;  %p1640_p11 = scmp.lt.u32.totalorder %s2186_s23, %s2273_s7 }
 0x3b7   : > { %p1641_p5 = scmp.lt.u32.totalorder %s1639_s22, %s1635_s13  ;;  %p1643_p10 = scmp.lt.u32.totalorder %s1635_s13, %s2186_s23 }
 0x3b8   : > { %p1637_p7 = pnand %p1636_p3, %p2272_p0 }
 0x3b9   : > { %p1642_p1 = por %p1641_p5, %p1640_p11 }
 0x3ba   : > { %p1638_p12 = pneg %p1637_p7 }
 0x3bb   : > { %p1644_p13 = por %p1643_p10, %p1642_p1 }
 0x3bd   : > { %p1645_p2 = pnand %p1644_p13, %p1638_p12 }
 0x3bf   : > { %1648 = shalt.err (!%p1645_p2)
}
 0x3c0   : > { %s1737_s15 = smov 128   ;;  %s1738_s18 = smov 8  }
 0x3c1   : > { %1282 = dma.vmem_to_hbm [thread:$0]  (%p2272_p0), %s2181_s3, 256, %s2186_s23, %s915_s30, %s1737_s15, %s1737_s15, %s1738_s18  }
 0x3c2 PF: > { %s962_s17 = sand.u32 1, %s1699_s27   ;;  %p2274_p8 = scmp.ne.s32.totalorder %s2267_s19, 0 }
 0x3c3   : > { %p2275_p9 = scmp.ge.s32.totalorder %s1719_s10, 2  ;;  %s963_s20 = scalar_lea.sflag [#allocation4], %s962_s17 }
 0x3c5   : > { %p1310_p4 = pnand %p2275_p9, %p2274_p8 }
 0x3c7   : > { %1690 = dma.done.wait (!%p1310_p4), %s963_s20, 256  }
 0x3c8   : > { %1692 = vsyncadd (!%p1310_p4), %s963_s20, 4294967040  ;;  %s972_s12 = scalar_lea.sflag [#allocation16], %s962_s17 }
 0x3c9   : > { %1694 = dma.done.wait (!%p1310_p4), %s972_s12, 16  }
 0x3ca   : > { %1696 = vsyncadd (!%p1310_p4), %s972_s12, 4294967280  ;;  %s31_s10 = sadd.s32 1, %s1719_s10   ;;  %s2276_s27 = smov %s1703_s28 }
 0x3cb   : > { %p28_p6 = scmp.ge.s32.totalorder %s31_s10, 4   ;;  %s2277_s28 = smov %s1707_s29 }
 0x3cc   : > { %s2278_s29 = smov %s2001_s16  ;;  %s2279_s30 = smov %s1715_s9 }
 0x3cd   : > { %s2280_s9 = smov %s2282_s26  ;;  %30 = sbr.rel (!%p28_p6) target bundleno = 15 (0xf), region = 134 }
 0x3d4   :  { %976 = vsyncpa [#allocation3], 1 }
 0x3d5   :  { %978 = vsyncpa [#allocation3 + $0x1], 1 }
 0x3d6   :  { %979 = vsyncpa [#allocation6], 1 }
 0x3d7   :  { %980 = vsyncpa [#allocation9], 1 }
 0x3d8   :  { %981 = vsyncpa [#allocation12], 1 }
 0x3d9   :  { %982 = vsyncpa [#allocation4], 1 }
 0x3da   :  { %984 = vsyncpa [#allocation4 + $0x1], 1 }
 0x3db   :  { %985 = vsyncpa [#allocation16], 1 }
 0x3dc   :  { %987 = vsyncpa [#allocation16 + $0x1], 1 }

</bundles_post_ra>
